<compile_context>
chip_gen: v7x
topology: tpu7x:2x2x1
jax: 0.10.0
libtpu: 0.0.40
codegen_flags: <defaults>
</compile_context>

<pallas_src>
import math

import jax
import jax.numpy as jnp
from jax.experimental import pallas as pl
from jax.experimental.pallas import tpu as pltpu


def _round_up(n, m):
    return ((n + m - 1) // m) * m


def _schedule_mlp_kernel(x_ref, w1_ref, b1_ref, w2_ref, b2_ref, out_ref):
    # x_ref  : (tb, pack*input_size)  -- `pack` batch rows packed per lane-row
    # w1_ref : (pack*input_size, pack*16)    block-diag kron(I_pack, W1^T)
    # b1_ref : (1, pack*16)
    # w2_ref : (pack*16, pack*out_size)      block-diag kron(I_pack, W2^T)
    # b2_ref : (1, pack*out_size)
    # out_ref: (tb, pack*out_size)
    h = jnp.dot(x_ref[...], w1_ref[...], preferred_element_type=jnp.float32)
    h = jnp.maximum(h + b1_ref[...], 0.0)          # fc1 bias + ReLU
    # Dropout(p=0.15) -> identity in eval mode.
    y = jnp.dot(h, w2_ref[...], preferred_element_type=jnp.float32)
    out_ref[...] = (y + b2_ref[...]).astype(out_ref.dtype)


def schedule_model_forward(x, w1, b1, w2, b2, input_size, *,
                           block_rows=32768, min_pallas_batch=1024,
                           out_dtype=jnp.float32):
    """x: (batch, input_size) f32 -> (-1, input_size, 3), same as the PyTorch module.

    w1: (16, input_size), b1: (16,), w2: (out_size, 16), b2: (out_size,)
    (same storage layout as torch.nn.Linear).
    """
    batch = x.shape[0]
    out_size = w2.shape[0]

    # Smallest pack so that pack*input_size is a multiple of 128 lanes.
    pack = 128 // math.gcd(128, input_size)

    if batch < min_pallas_batch or batch % pack != 0 or pack > 32:
        # Small / ragged-batch fast path: launch-overhead bound, plain XLA
        # fusion is as fast as the kernel with zero padding glue.  pack > 32
        # (input_size sharing no useful factor with 128) would also make the
        # block-diagonal weights too large to keep VMEM-resident.
        y = jnp.maximum(x @ w1.T + b1, 0.0) @ w2.T + b2
        return y.astype(out_dtype).reshape(-1, input_size, 3)

    rows_p = batch // pack
    in_w = pack * input_size        # 128 for input_size=8
    hid_w = pack * 16               # 256
    out_w = pack * out_size         # 384 for out_size=24

    # Free, copy-less view of the natural row-major input.
    x_p = x.reshape(rows_p, in_w)

    # Block-diagonal packed weights (tiny, VMEM-resident for the whole grid).
    eye = jnp.eye(pack, dtype=jnp.float32)
    w1_p = jnp.kron(eye, w1.T.astype(jnp.float32))          # (in_w, hid_w)
    w2_p = jnp.kron(eye, w2.T.astype(jnp.float32))          # (hid_w, out_w)
    b1_p = jnp.tile(b1.astype(jnp.float32), pack).reshape(1, hid_w)
    b2_p = jnp.tile(b2.astype(jnp.float32), pack).reshape(1, out_w)

    # Tile size: target `block_rows` original rows per grid step, keep >=2
    # grid steps (so v7x's two TensorCores both get work), stay within the
    # VMEM budget (double-buffered in+out tiles plus one set of temporaries).
    tb = max(8, block_rows // pack)
    tb = min(tb, _round_up(pl.cdiv(rows_p, 2), 8))
    per_row_bytes = 4 * (2 * in_w + 2 * out_w + (in_w + hid_w + out_w))
    vmem_budget = 24 << 20                      # headroom under the 32 MiB limit
    tb = min(tb, max(8, (vmem_budget // per_row_bytes) // 8 * 8))

    # Ragged final block is fine: junk OOB rows are computed and their writes
    # are dropped by Pallas, so no jnp.pad / extra HBM pass is needed.
    grid = (pl.cdiv(rows_p, tb),)

    y_p = pl.pallas_call(
        _schedule_mlp_kernel,
        out_shape=jax.ShapeDtypeStruct((rows_p, out_w), out_dtype),
        grid=grid,
        in_specs=[
            pl.BlockSpec((tb, in_w), lambda i: (i, 0)),      # packed x tile
            pl.BlockSpec((in_w, hid_w), lambda i: (0, 0)),   # W1 (resident)
            pl.BlockSpec((1, hid_w), lambda i: (0, 0)),      # b1 (resident)
            pl.BlockSpec((hid_w, out_w), lambda i: (0, 0)),  # W2 (resident)
            pl.BlockSpec((1, out_w), lambda i: (0, 0)),      # b2 (resident)
        ],
        out_specs=pl.BlockSpec((tb, out_w), lambda i: (i, 0)),
        compiler_params=pltpu.CompilerParams(
            dimension_semantics=("parallel",),
            vmem_limit_bytes=32 * 1024 * 1024,
        ),
    )(x_p, w1_p, b1_p, w2_p, b2_p)

    # Packed rows are already in row-major (batch, out_size) order -> the
    # final .view(-1, input_size, 3) is a free reshape.
    return y_p.reshape(-1, input_size, 3)


def init_params(key, input_size, output_size):
    """nn.Linear-style init U(-1/sqrt(fan_in), 1/sqrt(fan_in)); PyTorch layout."""
    k1, k2, k3, k4 = jax.random.split(key, 4)
    lim1 = 1.0 / jnp.sqrt(jnp.float32(input_size))
    lim2 = 1.0 / jnp.sqrt(jnp.float32(16))
    w1 = jax.random.uniform(k1, (16, input_size), jnp.float32, -lim1, lim1)
    b1 = jax.random.uniform(k2, (16,), jnp.float32, -lim1, lim1)
    w2 = jax.random.uniform(k3, (output_size, 16), jnp.float32, -lim2, lim2)
    b2 = jax.random.uniform(k4, (output_size,), jnp.float32, -lim2, lim2)
    return w1, b1, w2, b2


if __name__ == "__main__":
    input_size = 8                  # e.g. 8 employee-day slots
    output_size = input_size * 3    # 3 classes per slot (matches the .view)

    key = jax.random.PRNGKey(0)
    kx, kp, kb, kr = jax.random.split(key, 4)
    w1, b1, w2, b2 = init_params(kp, input_size, output_size)

    def reference(xv):
        y = jnp.maximum(xv @ w1.T + b1, 0.0) @ w2.T + b2
        return y.reshape(-1, input_size, 3)

    # 1) Spec's small shape (batch=2): plain-XLA fast path (overhead bound).
    x_small = jax.random.normal(kx, (2, input_size), jnp.float32)
    out_small = jax.block_until_ready(
        schedule_model_forward(x_small, w1, b1, w2, b2, input_size))
    assert out_small.shape == (2, input_size, 3)
    assert jnp.allclose(out_small, reference(x_small), atol=1e-5, rtol=1e-5)

    # 2) Pallas kernel path (batch multiple of pack=16, >= min_pallas_batch).
    x_big = jax.random.normal(kb, (4096, input_size), jnp.float32)
    out_big = jax.block_until_ready(
        schedule_model_forward(x_big, w1, b1, w2, b2, input_size))
    assert out_big.shape == (4096, input_size, 3)
    # Both kernel and reference matmuls run at TPU-default (bf16-pass) MXU
    # precision; allow that rounding in the comparison.
    assert jnp.allclose(out_big, reference(x_big), atol=2e-2, rtol=2e-2)

    # 3) Pallas kernel path with a ragged final grid block (no padding pass).
    x_rag = jax.random.normal(kr, (4176, input_size), jnp.float32)
    out_rag = jax.block_until_ready(
        schedule_model_forward(x_rag, w1, b1, w2, b2, input_size))
    assert out_rag.shape == (4176, input_size, 3)
    assert jnp.allclose(out_rag, reference(x_rag), atol=2e-2, rtol=2e-2)

    print("KERNEL_OK")
</pallas_src>

<mosaic_0001>
module attributes {stable_mosaic.version = 11 : i64} {
  func.func @_schedule_mlp_kernel(%arg0: i32, %arg1: memref<128x128xf32, #tpu.memory_space<vmem>>, %arg2: memref<128x256xf32, #tpu.memory_space<vmem>>, %arg3: memref<1x256xf32, #tpu.memory_space<vmem>>, %arg4: memref<256x384xf32, #tpu.memory_space<vmem>>, %arg5: memref<1x384xf32, #tpu.memory_space<vmem>>, %arg6: memref<128x384xf32, #tpu.memory_space<vmem>>) attributes {dimension_semantics = [#tpu.dimension_semantics<parallel>], iteration_bounds = array<i64: 2>, scalar_prefetch = 0 : i64, scratch_operands = 0 : i64, tpu.core_type = #tpu.core_type<tc>, window_params = [{transform_indices = @transform_0, window_bounds = array<i64: 128, 128>}, {pipeline_mode = #tpu.pipeline_mode<synchronous>, transform_indices = @transform_1, window_bounds = array<i64: 128, 256>}, {pipeline_mode = #tpu.pipeline_mode<synchronous>, transform_indices = @transform_2, window_bounds = array<i64: 1, 256>}, {pipeline_mode = #tpu.pipeline_mode<synchronous>, transform_indices = @transform_3, window_bounds = array<i64: 256, 384>}, {pipeline_mode = #tpu.pipeline_mode<synchronous>, transform_indices = @transform_4, window_bounds = array<i64: 1, 384>}, {transform_indices = @transform_5, window_bounds = array<i64: 128, 384>}]} {
    %c0 = arith.constant 0 : index
    %c0_0 = arith.constant 0 : index
    %0 = vector.load %arg1[%c0, %c0_0] : memref<128x128xf32, #tpu.memory_space<vmem>>, vector<128x128xf32>
    %c0_1 = arith.constant 0 : index
    %c0_2 = arith.constant 0 : index
    %1 = vector.load %arg2[%c0_1, %c0_2] : memref<128x256xf32, #tpu.memory_space<vmem>>, vector<128x256xf32>
    %cst = arith.constant dense<0.000000e+00> : vector<128x256xf32>
    %2 = tpu.matmul %0, %1, %cst {dimension_numbers = #tpu.dot_dimension_numbers<[1], [0], [0], [1], [0, 0, 1, 1], [], []>} : vector<128x128xf32>, vector<128x256xf32>, vector<128x256xf32> -> vector<128x256xf32>
    %c0_3 = arith.constant 0 : index
    %c0_4 = arith.constant 0 : index
    %3 = vector.load %arg3[%c0_3, %c0_4] : memref<1x256xf32, #tpu.memory_space<vmem>>, vector<1x256xf32>
    %4 = vector.broadcast %3 : vector<1x256xf32> to vector<128x256xf32>
    %5 = arith.addf %2, %4 : vector<128x256xf32>
    %cst_5 = arith.constant 0.000000e+00 : f32
    %6 = vector.broadcast %cst_5 : f32 to vector<128x256xf32>
    %7 = arith.maximumf %5, %6 : vector<128x256xf32>
    %c0_6 = arith.constant 0 : index
    %c0_7 = arith.constant 0 : index
    %8 = vector.load %arg4[%c0_6, %c0_7] : memref<256x384xf32, #tpu.memory_space<vmem>>, vector<256x384xf32>
    %cst_8 = arith.constant dense<0.000000e+00> : vector<128x384xf32>
    %9 = tpu.matmul %7, %8, %cst_8 {dimension_numbers = #tpu.dot_dimension_numbers<[1], [0], [0], [1], [0, 0, 1, 1], [], []>} : vector<128x256xf32>, vector<256x384xf32>, vector<128x384xf32> -> vector<128x384xf32>
    %c0_9 = arith.constant 0 : index
    %c0_10 = arith.constant 0 : index
    %10 = vector.load %arg5[%c0_9, %c0_10] : memref<1x384xf32, #tpu.memory_space<vmem>>, vector<1x384xf32>
    %11 = vector.broadcast %10 : vector<1x384xf32> to vector<128x384xf32>
    %12 = arith.addf %9, %11 : vector<128x384xf32>
    %c0_11 = arith.constant 0 : index
    %c0_12 = arith.constant 0 : index
    %13 = vector.load %arg6[%c0_11, %c0_12] : memref<128x384xf32, #tpu.memory_space<vmem>>, vector<128x384xf32>
    tpu.vector_store %arg6[%c0_11, %c0_12], %12 {strides = array<i32>} : memref<128x384xf32, #tpu.memory_space<vmem>>, vector<128x384xf32>,
    return
  }
  func.func @transform_0(%arg0: i32) -> (i32, i32) {
    %c0_i32 = arith.constant 0 : i32
    %c0_i32_0 = arith.constant 0 : i32
    return %arg0, %c0_i32 : i32, i32
  }
  func.func @transform_1(%arg0: i32) -> (i32, i32) {
    %c0_i32 = arith.constant 0 : i32
    %c0_i32_0 = arith.constant 0 : i32
    %c0_i32_1 = arith.constant 0 : i32
    return %c0_i32, %c0_i32_0 : i32, i32
  }
  func.func @transform_2(%arg0: i32) -> (i32, i32) {
    %c0_i32 = arith.constant 0 : i32
    %c0_i32_0 = arith.constant 0 : i32
    %c0_i32_1 = arith.constant 0 : i32
    return %c0_i32, %c0_i32_0 : i32, i32
  }
  func.func @transform_3(%arg0: i32) -> (i32, i32) {
    %c0_i32 = arith.constant 0 : i32
    %c0_i32_0 = arith.constant 0 : i32
    %c0_i32_1 = arith.constant 0 : i32
    return %c0_i32, %c0_i32_0 : i32, i32
  }
  func.func @transform_4(%arg0: i32) -> (i32, i32) {
    %c0_i32 = arith.constant 0 : i32
    %c0_i32_0 = arith.constant 0 : i32
    %c0_i32_1 = arith.constant 0 : i32
    return %c0_i32, %c0_i32_0 : i32, i32
  }
  func.func @transform_5(%arg0: i32) -> (i32, i32) {
    %c0_i32 = arith.constant 0 : i32
    %c0_i32_0 = arith.constant 0 : i32
    return %arg0, %c0_i32 : i32, i32
  }
}

</mosaic_0001>

<bundles_post_ra>
// kernel: tpu_custom_call.1
= control target key start
LH: loop header
LB: loop body
LE: loop exit
PB: predicated region body
PF: predicated region fallthrough
CT: control target
= control target key end

     0   :  { %10 = vsyncpa [#allocation3], 0  ;;  %s2115_s0 = inlined_call_operand.hbm [shape: f32[256,128], index: 0, kind: input, shape index: {}]   ;;  %s2116_s1 = inlined_call_operand.hbm [shape: f32[128,256], index: 1, kind: input, shape index: {}]   ;;  %s2117_s2 = inlined_call_operand.vmem [shape: f32[1,256], index: 2, kind: input, shape index: {}]   ;;  %s2118_s3 = inlined_call_operand.hbm [shape: f32[256,384], index: 3, kind: input, shape index: {}]   ;;  %s2119_s4 = inlined_call_operand.vmem [shape: f32[1,384], index: 4, kind: input, shape index: {}]   ;;  %s2120_s5 = inlined_call_operand.hbm [shape: f32[256,384], index: 5, kind: output, shape index: {}]  }
   0x1   :  { %12 = vsyncpa [#allocation3 + $0x1], 0 }
   0x2   :  { %13 = vsyncpa [#allocation6], 0 }
   0x3   :  { %14 = vsyncpa [#allocation4], 0 }
   0x4   :  { %16 = vsyncpa [#allocation4 + $0x1], 0  ;;  %s1622_s18 = smov 0   ;;  %s1624_s19 = smov 0  }
   0x5   :  { %s1626_s20 = smov 0   ;;  %s1628_s21 = smov 0  }
   0x6 LB: > { %s1643_s22 = sadd.s32 4294967295, %s1577_s21   ;;  %s1101_s23 = sadd.s32 4294967294, %s1577_s21   ;;  %s1577_s21 = sphi %s1628_s21, %s2140_s21   ;;  %s1573_s20 = sphi %s1626_s20, %s2139_s20   ;;  %s1569_s19 = sphi %s1624_s19, %s2138_s19   ;;  %s1565_s18 = sphi %s1622_s18, %s2137_s18  }
   0x7   : > { %p42_p0 = scmp.ne.s32.totalorder %s1569_s19, %s1565_s18  ;;  %p2121_p1 = scmp.eq.s32.totalorder %s1643_s22, 0 }
   0x8   : > { %p156_p3 = scmp.eq.s32.totalorder %s1101_s23, 1  ;;  %p1102_p5 = scmp.ge.s32.totalorder %s1577_s21, 1 }
   0x9   : > { %p1652_p4 = por %p2121_p1, %p42_p0  ;;  %p163_p7 = scmp.lt.s32.totalorder %s1577_s21, 3 }
   0xa   : > { %p1657_p6 = por %p156_p3, %p42_p0  ;;  %s1579_s27 = smov [#allocation5]  }
   0xb   : > { %s2124_s24 = scalar_select %p1652_p4, 1, 0 }
   0xc   : > { %s2125_s25 = scalar_select %p1657_p6, 1, 0 }
   0xd   : > { %p1662_p8 = pnand %p1102_p5, %p163_p7  ;;  %s175_s28 = sshll.u32 %s1579_s27, 4  ;;  %s1666_s28 = int_to_ptr.vmem [resolvable:$true] %s175_s28 }
   0xe   : > { %s1580_s30 = smov [#allocation7]   ;;  %s1421_s9 = scalar_lea.hbm %s2116_s1, 4096 }
   0xf   : > { %p1357_p9 = pneg %p1662_p8  ;;  %s191_s6 = sshll.u32 %s1580_s30, 4  ;;  %s1677_s6 = int_to_ptr.vmem [resolvable:$true] %s191_s6 }
  0x10   : > { %p1422_p12 = scmp.ne.s32.totalorder %s2116_s1, %s1421_s9  ;;  %p1428_p5 = scmp.lt.u32.totalorder %s1421_s9, %s2116_s1 }
  0x11   : > { %p1673_p11 = pnand %p1357_p9, %p2121_p1 }
  0x13   : > { %p1423_p13 = pneg %p1673_p11 }
  0x15   : > { %p1424_p0 = pnand %p1423_p13, %p1422_p12 }
  0x17   : > { %p1425_p3 = pneg %p1424_p0 }
  0x19   : > { %p1430_p7 = pnand %p1428_p5, %p1425_p3 }
  0x1b   : > { %1433 = shalt.err (!%p1430_p7)
}
  0x1c   : > { %s1434_s14 = scalar_lea.vmem %s1666_s28, 4096  ;;  %p1442_p2 = scmp.lt.s32.totalorder %s1666_s28, %s1666_s28 }
  0x1d   : > { %p1435_p9 = scmp.ne.s32.totalorder %s1666_s28, %s1434_s14  ;;  %p1443_p12 = scmp.lt.s32.totalorder %s1434_s14, %s1434_s14 }
  0x1f   : > { %p1437_p10 = pnand %p1435_p9, %p1423_p13  ;;  %p1444_p0 = por %p1443_p12, %p1442_p2 }
  0x21   : > { %p1438_p1 = pneg %p1437_p10 }
  0x23   : > { %p1445_p6 = pnand %p1444_p0, %p1438_p1 }
  0x25   : > { %1448 = shalt.err (!%p1445_p6)
}
  0x26   : > { %s1581_s15 = smov 256   ;;  %s1582_s16 = smov 16  }
  0x27   : > { %1360 = dma.hbm_to_vmem [thread:$0]  (!%p1673_p11), %s2116_s1, 4096, %s1666_s28, [#allocation6], %s1581_s15, %s1581_s15, %s1582_s16  }
  0x28   : > { %s1449_s7 = scalar_lea.hbm %s2118_s3, 12288 }
  0x29   : > { %p1450_p2 = scmp.ne.s32.totalorder %s2118_s3, %s1449_s7  ;;  %p1456_p10 = scmp.lt.u32.totalorder %s1449_s7, %s2118_s3 }
  0x2b   : > { %p1452_p1 = pnand %p1450_p2, %p1423_p13 }
  0x2d   : > { %p1453_p6 = pneg %p1452_p1 }
  0x2f   : > { %p1458_p3 = pnand %p1456_p10, %p1453_p6 }
  0x31   : > { %1461 = shalt.err (!%p1458_p3)
}
  0x32   : > { %s1462_s28 = scalar_lea.vmem %s1677_s6, 12288  ;;  %p1470_p12 = scmp.lt.s32.totalorder %s1677_s6, %s1677_s6 }
  0x33   : > { %p1463_p5 = scmp.ne.s32.totalorder %s1677_s6, %s1462_s28  ;;  %p1471_p0 = scmp.lt.s32.totalorder %s1462_s28, %s1462_s28 }
  0x35   : > { %p1465_p7 = pnand %p1463_p5, %p1423_p13  ;;  %p1472_p2 = por %p1471_p0, %p1470_p12 }
  0x37   : > { %p1466_p9 = pneg %p1465_p7 }
  0x39   : > { %p1473_p1 = pnand %p1472_p2, %p1466_p9 }
  0x3b   : > { %1476 = shalt.err (!%p1473_p1)
}
  0x3c   : > { %s1583_s12 = smov 384   ;;  %s1584_s13 = smov 24  }
  0x3d   : > { %1363 = dma.hbm_to_vmem [thread:$0]  (!%p1673_p11), %s2118_s3, 12288, %s1677_s6, [#allocation6], %s1583_s12, %s1583_s12, %s1584_s13  }
  0x3e   : > { %s1732_s16 = sadd.s32 1, %s1577_s21   ;;  %s29_s23 = sadd.s32 1, %s1573_s20 }
  0x3f   : > { %s26_s17 = ssub.s32 %s1577_s21, %s1732_s16  ;;  %p36_p6 = scmp.ne.s32.totalorder %s1573_s20, %s1569_s19 }
  0x40   : > { %p27_p13 = scmp.eq.s32.totalorder %s26_s17, 0  ;;  %p37_p10 = scmp.eq.s32.totalorder %s1577_s21, 0 }
  0x41   : > { %p2128_p5 = scmp.eq.s32.totalorder %s1643_s22, 1  ;;  %p1374_p9 = scmp.lt.s32.totalorder %s1577_s21, 2 }
  0x42   : > { %s1741_s27 = scalar_select %p27_p13, %s1573_s20, %s29_s23  }
  0x43   : > { %p38_p3 = por %p37_p10, %p36_p6  ;;  %p1745_p7 = por %p2128_p5, %p36_p6 }
  0x44   : > { %s208_s29 = sand.u32 1, %s1573_s20   ;;  %s1118_s6 = sshll.u32 %s1577_s21, 11 }
  0x45   : > { %s2129_s30 = scalar_select %p1745_p7, 1, 0 }
  0x46   : > { %s1106_s7 = sshll.u32 %s208_s29, 7  ;;  %s1755_s10 = scalar_lea.hbm %s2115_s0, %s1118_s6 }
  0x47   : > { %s212_s11 = scalar_lea.vmem [#allocation2], %s1106_s7  ;;  %p1759_p11 = pnand %p1374_p9, %p38_p3 }
  0x48   : > { %s219_s28 = sshll.u32 %s212_s11, 4  ;;  %s1763_s13 = scalar_lea.sflag [#allocation3], %s208_s29  ;;  %s1757_s28 = int_to_ptr.vmem [resolvable:$true] %s219_s28 }
  0x49   : > { %s1477_s14 = scalar_lea.hbm %s1755_s10, 2048  ;;  %p1479_p0 = pneg %p1759_p11 }
  0x4a   : > { %p1478_p12 = scmp.ne.s32.totalorder %s1755_s10, %s1477_s14  ;;  %s1482_s23 = scalar_lea.hbm %s2115_s0, 4096 }
  0x4b   : > { %p1483_p13 = scmp.lt.u32.totalorder %s1755_s10, %s2115_s0  ;;  %p1484_p6 = scmp.lt.u32.totalorder %s1482_s23, %s1477_s14 }
  0x4c   : > { %p1480_p2 = pnand %p1479_p0, %p1478_p12  ;;  %p1486_p3 = scmp.lt.u32.totalorder %s1477_s14, %s1755_s10 }
  0x4d   : > { %p1485_p10 = por %p1484_p6, %p1483_p13 }
  0x4e   : > { %p1481_p1 = pneg %p1480_p2 }
  0x4f   : > { %p1487_p5 = por %p1486_p3, %p1485_p10 }
  0x51   : > { %p1488_p9 = pnand %p1487_p5, %p1481_p1 }
  0x53   : > { %1491 = shalt.err (!%p1488_p9)
}
  0x54   : > { %s1492_s29 = scalar_lea.vmem %s1757_s28, 2048  ;;  %s1585_s8 = smov [#allocation2]  }
  0x55   : > { %p1493_p12 = scmp.ne.s32.totalorder %s1757_s28, %s1492_s29  ;;  %s1497_s9 = sshll.u32 %s1585_s8, 4  ;;  %s1498_s9 = int_to_ptr.vmem [resolvable:$false] %s1497_s9 }
  0x56   : > { %s1499_s11 = scalar_lea.vmem %s1498_s9, 4096  ;;  %p1500_p4 = scmp.lt.s32.totalorder %s1757_s28, %s1498_s9 }
  0x57   : > { %p1495_p2 = pnand %p1493_p12, %p1479_p0  ;;  %p1501_p13 = scmp.lt.s32.totalorder %s1499_s11, %s1492_s29 }
  0x59   : > { %p1496_p7 = pneg %p1495_p2  ;;  %p1502_p6 = por %p1501_p13, %p1500_p4 }
  0x5b   : > { %p1503_p10 = pnand %p1502_p6, %p1496_p7 }
  0x5d   : > { %1506 = shalt.err (!%p1503_p10)
}
  0x5e   : > { %s1586_s14 = smov 128   ;;  %s1587_s15 = smov 8  }
  0x5f   : > { %1367 = dma.hbm_to_vmem [thread:$0]  (!%p1759_p11), %s1755_s10, 2048, %s1757_s28, %s1763_s13, %s1586_s14, %s1586_s14, %s1587_s15  }
  0x60   : > { %231 = sbr.rel (%p1662_p8) target bundleno = 668 (0x29c), region = 40  ;;  %s1794_s17 = sand.u32 (!%p1662_p8), 1, %s1569_s19  }
  0x61   : > { %s1110_s23 = sshll.u32 (!%p1662_p8), %s1794_s17, 7  ;;  %s234_s7 = scalar_lea.sflag (!%p1662_p8), [#allocation3], %s1794_s17 }
  0x62   : > { %s1798_s6 = scalar_lea.vmem (!%p1662_p8), [#allocation2], %s1110_s23  ;;  %p2131_p4 = scmp.ne.s32.totalorder (!%p1662_p8), %s2124_s24, 0 }
  0x67   : > { %1552 = dma.done.wait (%p2131_p4), %s234_s7, 2048  }
  0x68   : > { %1554 = vsyncadd (%p2131_p4), %s234_s7, 4294965248  ;;  %p2132_p7 = scmp.eq.s32.totalorder %s1643_s22, 0 }
  0x6a   : > { %1556 = dma.done.wait (%p2132_p7), [#allocation6], 16384   ;;  %p2133_p8 = pmov %p2132_p7 }
  0x6b   : > { %v1588_v0 = vmov 0.0   ;;  %v291_v1 = vld [vmem:[#allocation5 + $0x8] sm:$0xff]  ;;  %v293_v2 = vld [vmem:[#allocation5 + $0x18] sm:$0xff]  ;;  %v290_v3 = vld [vmem:[#allocation5] sm:$0xff]  ;;  %s1343_s12 = smul.u32 384, %s1794_s17  ;;  %p2134_p0 = scmp.ne.s32.totalorder %s2129_s30, 0 }
  0x6c   : > { %1558 = vsyncadd (%p2133_p8), [#allocation6], 4294950912  ;;  %398 = vmatprep.mubr.f32.mxu0 %v1588_v0  ;;  %v1199_v4 = vpack.c.bf16 %v293_v2, %v291_v1  ;;  %v292_v5 = vld [vmem:[#allocation5 + $0x10] sm:$0xff]  ;;  %v295_v6 = vld [vmem:[#allocation5 + $0x28] sm:$0xff]  ;;  %s1344_s29 = smul.u32 6144, %s1643_s22  ;;  %s995_s22 = scalar_lea.sflag [#allocation4], %s1794_s17 }
  0x6d   : > { %v297_v7 = vld [vmem:[#allocation5 + $0x38] sm:$0xff]  ;;  %v1201_v8 = vpack.c.bf16 %v292_v5, %v290_v3  ;;  %v294_v10 = vld [vmem:[#allocation5 + $0x20] sm:$0xff]  ;;  %v296_v11 = vld [vmem:[#allocation5 + $0x30] sm:$0xff]  ;;  %s1968_s13 = scalar_lea.vmem [#allocation8], %s1343_s12  ;;  %s1589_s23 = smov [#allocation8]  }
  0x6e   : > { %v1203_v9 = vpack.c.bf16 %v297_v7, %v295_v6  ;;  %v299_v12 = vld [vmem:[#allocation5 + $0x48] sm:$0xff]  ;;  %1200 = vmatprep.subr.bf16.mxu0 %v1199_v4  ;;  %v301_v13 = vld [vmem:[#allocation5 + $0x58] sm:$0xff]  ;;  %v1205_v14 = vpack.c.bf16 %v296_v11, %v294_v10  ;;  %v298_v16 = vld [vmem:[#allocation5 + $0x40] sm:$0xff]  ;;  %s1009_s8 = sshll.u32 %s1968_s13, 4  ;;  %s2067_s14 = scalar_lea.hbm %s2120_s5, %s1344_s29  ;;  %s2069_s8 = int_to_ptr.vmem [resolvable:$true] %s1009_s8 }
  0x6f   : > { %1202 = vmatpush1.bf16.msra.mxu0 %v1201_v8  ;;  %v1207_v15 = vpack.c.bf16 %v301_v13, %v299_v12  ;;  %v300_v17 = vld [vmem:[#allocation5 + $0x50] sm:$0xff]  ;;  %v303_v18 = vld [vmem:[#allocation5 + $0x68] sm:$0xff]  ;;  %v305_v19 = vld [vmem:[#allocation5 + $0x78] sm:$0xff]  ;;  %s1507_s15 = scalar_lea.vmem %s2069_s8, 6144  ;;  %s1511_s7 = sshll.u32 %s1589_s23, 4  ;;  %s1512_s7 = int_to_ptr.vmem [resolvable:$false] %s1511_s7 }
  0x70   : > { %1204 = vmatprep.subr.bf16.mxu0 %v1203_v9  ;;  %v1209_v20 = vpack.c.bf16 %v300_v17, %v298_v16  ;;  %v1211_v21 = vpack.c.bf16 %v305_v19, %v303_v18  ;;  %v302_v22 = vld [vmem:[#allocation5 + $0x60] sm:$0xff]  ;;  %v304_v23 = vld [vmem:[#allocation5 + $0x70] sm:$0xff]  ;;  %v307_v24 = vld [vmem:[#allocation5 + $0x88] sm:$0xff]  ;;  %p1508_p11 = scmp.ne.s32.totalorder %s2069_s8, %s1507_s15  ;;  %p1514_p5 = scmp.lt.s32.totalorder %s2069_s8, %s1512_s7 }
  0x71   : > { %v309_v25 = vld [vmem:[#allocation5 + $0x98] sm:$0xff]  ;;  %v1213_v26 = vpack.c.bf16 %v304_v23, %v302_v22  ;;  %v306_v28 = vld [vmem:[#allocation5 + $0x80] sm:$0xff]  ;;  %v308_v29 = vld [vmem:[#allocation5 + $0x90] sm:$0xff] }
  0x72   : > { %v1215_v27 = vpack.c.bf16 %v309_v25, %v307_v24  ;;  %v311_v30 = vld [vmem:[#allocation5 + $0xa8] sm:$0xff]  ;;  %v313_v31 = vld [vmem:[#allocation5 + $0xb8] sm:$0xff]  ;;  %v310_v32 = vld [vmem:[#allocation5 + $0xa0] sm:$0xff]  ;;  %v1217_v34 = vpack.c.bf16 %v308_v29, %v306_v28  ;;  %p1509_p1 = pnand %p1508_p11, %p2134_p0 }
  0x73   : > { %1206 = vmatpush1.bf16.msra.mxu0 %v1205_v14  ;;  %v312_v33 = vld [vmem:[#allocation5 + $0xb0] sm:$0xff]  ;;  %v315_v35 = vld [vmem:[#allocation5 + $0xc8] sm:$0xff]  ;;  %v317_v36 = vld [vmem:[#allocation5 + $0xd8] sm:$0xff]  ;;  %v1219_v40 = vpack.c.bf16 %v313_v31, %v311_v30 }
  0x74   : > { %1208 = vmatprep.subr.bf16.mxu0 %v1207_v15  ;;  %v528_v37 = vld [vmem:[#allocation7 + $0x8] sm:$0xff]  ;;  %v531_v38 = vld [vmem:[#allocation7 + $0x20] sm:$0xff]  ;;  %v530_v42 = vld [vmem:[#allocation7 + $0x18] sm:$0xff]  ;;  %v1221_v51 = vpack.c.bf16 %v312_v33, %v310_v32  ;;  %v1223_v55 = vpack.c.bf16 %v317_v36, %v315_v35  ;;  %p1510_p3 = pneg %p1509_p1 }
  0x75   : > { %v527_v39 = vld [vmem:[#allocation7] sm:$0xff]  ;;  %v1231_v41 = vpack.c.bf16 %v531_v38, %v528_v37  ;;  %v534_v43 = vld [vmem:[#allocation7 + $0x38] sm:$0xff]  ;;  %v537_v44 = vld [vmem:[#allocation7 + $0x50] sm:$0xff] }
  0x76   : > { %v1233_v45 = vpack.c.bf16 %v530_v42, %v527_v39  ;;  %v1235_v46 = vpack.c.bf16 %v537_v44, %v534_v43  ;;  %v533_v47 = vld [vmem:[#allocation7 + $0x30] sm:$0xff]  ;;  %v536_v48 = vld [vmem:[#allocation7 + $0x48] sm:$0xff]  ;;  %v543_v50 = vld [vmem:[#allocation7 + $0x80] sm:$0xff] }
  0x77   : > { %1210 = vmatpush1.bf16.msra.mxu0 %v1209_v20  ;;  %v540_v49 = vld [vmem:[#allocation7 + $0x68] sm:$0xff]  ;;  %1232 = vmatprep.subr.bf16.mxu1 %v1231_v41  ;;  %v314_v52 = vld [vmem:[#allocation5 + $0xc0] sm:$0xff]  ;;  %v316_v53 = vld [vmem:[#allocation5 + $0xd0] sm:$0xff]  ;;  %v1237_v54 = vpack.c.bf16 %v536_v48, %v533_v47 }
  0x78   : > { %1212 = vmatprep.subr.bf16.mxu0 %v1211_v21  ;;  %1234 = vmatpush1.bf16.msra.mxu1 %v1233_v45  ;;  %v319_v56 = vld [vmem:[#allocation5 + $0xe8] sm:$0xff]  ;;  %v1239_v57 = vpack.c.bf16 %v543_v50, %v540_v49  ;;  %v539_v58 = vld [vmem:[#allocation7 + $0x60] sm:$0xff]  ;;  %v542_v59 = vld [vmem:[#allocation7 + $0x78] sm:$0xff]  ;;  %v1225_v63 = vpack.c.bf16 %v316_v53, %v314_v52 }
  0x79   : > { %1236 = vmatprep.subr.bf16.mxu1 %v1235_v46  ;;  %v321_v60 = vld [vmem:[#allocation5 + $0xf8] sm:$0xff]  ;;  %v549_v62 = vld [vmem:[#allocation7 + $0xb0] sm:$0xff]  ;;  %v318_v1 = vld [vmem:[#allocation5 + $0xe0] sm:$0xff]  ;;  %v1241_v2 = vpack.c.bf16 %v542_v59, %v539_v58 }
  0x7a   : > { %v546_v61 = vld [vmem:[#allocation7 + $0x98] sm:$0xff]  ;;  %v1227_v3 = vpack.c.bf16 %v321_v60, %v319_v56  ;;  %v320_v4 = vld [vmem:[#allocation5 + $0xf0] sm:$0xff]  ;;  %v548_v7 = vld [vmem:[#allocation7 + $0xa8] sm:$0xff] }
  0x7b   : > { %1214 = vmatpush1.bf16.msra.mxu0 %v1213_v26  ;;  %v1243_v5 = vpack.c.bf16 %v549_v62, %v546_v61  ;;  %v545_v6 = vld [vmem:[#allocation7 + $0x90] sm:$0xff]  ;;  %v552_v8 = vld [vmem:[#allocation7 + $0xc8] sm:$0xff]  ;;  %v555_v9 = vld [vmem:[#allocation7 + $0xe0] sm:$0xff]  ;;  %v1229_v12 = vpack.c.bf16 %v320_v4, %v318_v1 }
  0x7c   : > { %1216 = vmatprep.subr.bf16.mxu0 %v1215_v27  ;;  %1238 = vmatpush1.bf16.msra.mxu1 %v1237_v54  ;;  %v577_v10 = vld [vmem:[#allocation7 + $0x190] sm:$0xff]  ;;  %v580_v11 = vld [vmem:[#allocation7 + $0x1a8] sm:$0xff]  ;;  %v1245_v13 = vpack.c.bf16 %v548_v7, %v545_v6  ;;  %v1247_v14 = vpack.c.bf16 %v555_v9, %v552_v8  ;;  %v551_v15 = vld [vmem:[#allocation7 + $0xc0] sm:$0xff] }
  0x7d   : > { %1240 = vmatprep.subr.bf16.mxu1 %v1239_v57  ;;  %v554_v16 = vld [vmem:[#allocation7 + $0xd8] sm:$0xff]  ;;  %v1809_v18 = vpack.c.bf16 %v580_v11, %v577_v10  ;;  %v561_v19 = vld [vmem:[#allocation7 + $0x110] sm:$0xff]  ;;  %v532_v21 = vld [vmem:[#allocation7 + $0x28] sm:$0xff] }
  0x7e   : > { %v558_v17 = vld [vmem:[#allocation7 + $0xf8] sm:$0xff]  ;;  %v529_v20 = vld [vmem:[#allocation7 + $0x10] sm:$0xff]  ;;  %v583_v22 = vld [vmem:[#allocation7 + $0x1c0] sm:$0xff]  ;;  %v1249_v25 = vpack.c.bf16 %v554_v16, %v551_v15 }
  0x7f   : > { %1218 = vmatpush1.bf16.msra.mxu0 %v1217_v34  ;;  %v586_v23 = vld [vmem:[#allocation7 + $0x1d8] sm:$0xff]  ;;  %v274_v24 = vld [vmem:[%s1798_s6] sm:$0xff]  ;;  %v1251_v26 = vpack.c.bf16 %v561_v19, %v558_v17  ;;  %v557_v27 = vld [vmem:[#allocation7 + $0xf0] sm:$0xff]  ;;  %v1813_v30 = vpack.c.bf16 %v532_v21, %v529_v20 }
  0x80   : > { %1220 = vmatprep.subr.bf16.mxu0 %v1219_v40  ;;  %1242 = vmatpush1.bf16.msra.mxu1 %v1241_v2  ;;  %v560_v28 = vld [vmem:[#allocation7 + $0x108] sm:$0xff]  ;;  %v567_v31 = vld [vmem:[#allocation7 + $0x140] sm:$0xff]  ;;  %v1815_v32 = vpack.c.bf16 %v586_v23, %v583_v22  ;;  %v538_v34 = vld [vmem:[#allocation7 + $0x58] sm:$0xff] }
  0x81   : > { %1244 = vmatprep.subr.bf16.mxu1 %v1243_v5  ;;  %v564_v29 = vld [vmem:[#allocation7 + $0x128] sm:$0xff]  ;;  %v535_v33 = vld [vmem:[#allocation7 + $0x40] sm:$0xff]  ;;  %v589_v35 = vld [vmem:[#allocation7 + $0x1f0] sm:$0xff]  ;;  %v1253_v38 = vpack.c.bf16 %v560_v28, %v557_v27 }
  0x82   : > { %v592_v36 = vld [vmem:[#allocation7 + $0x208] sm:$0xff]  ;;  %v1255_v39 = vpack.c.bf16 %v567_v31, %v564_v29  ;;  %v563_v40 = vld [vmem:[#allocation7 + $0x120] sm:$0xff]  ;;  %v566_v41 = vld [vmem:[#allocation7 + $0x138] sm:$0xff]  ;;  %v1820_v43 = vpack.c.bf16 %v538_v34, %v535_v33 }
  0x83   : > { %1222 = vmatpush1.bf16.msra.mxu0 %v1221_v51  ;;  %v275_v37 = vld [vmem:[%s1798_s6 + $0x8] sm:$0xff]  ;;  %v570_v42 = vld [vmem:[#allocation7 + $0x158] sm:$0xff]  ;;  %v573_v44 = vld [vmem:[#allocation7 + $0x170] sm:$0xff]  ;;  %v1823_v45 = vpack.c.bf16 %v592_v36, %v589_v35  ;;  %v1257_v51 = vpack.c.bf16 %v566_v41, %v563_v40 }
  0x84   : > { %1224 = vmatprep.subr.bf16.mxu0 %v1223_v55  ;;  %1246 = vmatpush1.bf16.msra.mxu1 %v1245_v13  ;;  %v541_v46 = vld [vmem:[#allocation7 + $0x70] sm:$0xff]  ;;  %v544_v47 = vld [vmem:[#allocation7 + $0x88] sm:$0xff]  ;;  %v595_v48 = vld [vmem:[#allocation7 + $0x220] sm:$0xff]  ;;  %v1259_v52 = vpack.c.bf16 %v573_v44, %v570_v42 }
  0x85   : > { %1248 = vmatprep.subr.bf16.mxu1 %v1247_v14  ;;  %v598_v49 = vld [vmem:[#allocation7 + $0x238] sm:$0xff]  ;;  %v276_v50 = vld [vmem:[%s1798_s6 + $0x10] sm:$0xff]  ;;  %v572_v54 = vld [vmem:[#allocation7 + $0x168] sm:$0xff]  ;;  %v1828_v56 = vpack.c.bf16 %v544_v47, %v541_v46 }
  0x86   : > { %v569_v53 = vld [vmem:[#allocation7 + $0x150] sm:$0xff]  ;;  %v576_v55 = vld [vmem:[#allocation7 + $0x188] sm:$0xff]  ;;  %v579_v57 = vld [vmem:[#allocation7 + $0x1a0] sm:$0xff]  ;;  %v1831_v58 = vpack.c.bf16 %v598_v49, %v595_v48 }
  0x87   : > { %1226 = vmatpush1.bf16.msra.mxu0 %v1225_v63  ;;  %v547_v59 = vld [vmem:[#allocation7 + $0xa0] sm:$0xff]  ;;  %v550_v60 = vld [vmem:[#allocation7 + $0xb8] sm:$0xff]  ;;  %v601_v61 = vld [vmem:[#allocation7 + $0x250] sm:$0xff]  ;;  %v1261_v1 = vpack.c.bf16 %v572_v54, %v569_v53  ;;  %v1263_v2 = vpack.c.bf16 %v579_v57, %v576_v55 }
  0x88   : > { %1228 = vmatprep.subr.bf16.mxu0 %v1227_v3  ;;  %1250 = vmatpush1.bf16.msra.mxu1 %v1249_v25  ;;  %v604_v62 = vld [vmem:[#allocation7 + $0x268] sm:$0xff]  ;;  %v277_v63 = vld [vmem:[%s1798_s6 + $0x18] sm:$0xff]  ;;  %v575_v3 = vld [vmem:[#allocation7 + $0x180] sm:$0xff]  ;;  %v1836_v6 = vpack.c.bf16 %v550_v60, %v547_v59 }
  0x89   : > { %1252 = vmatprep.subr.bf16.mxu1 %v1251_v26  ;;  %v578_v4 = vld [vmem:[#allocation7 + $0x198] sm:$0xff]  ;;  %v585_v7 = vld [vmem:[#allocation7 + $0x1d0] sm:$0xff]  ;;  %v1839_v8 = vpack.c.bf16 %v604_v62, %v601_v61  ;;  %v556_v10 = vld [vmem:[#allocation7 + $0xe8] sm:$0xff] }
  0x8a   : > { %v582_v5 = vld [vmem:[#allocation7 + $0x1b8] sm:$0xff]  ;;  %v553_v9 = vld [vmem:[#allocation7 + $0xd0] sm:$0xff]  ;;  %v607_v11 = vld [vmem:[#allocation7 + $0x280] sm:$0xff]  ;;  %v1265_v14 = vpack.c.bf16 %v578_v4, %v575_v3 }
  0x8b   : > { %1230 = vmatpush1.bf16.msra.mxu0 %v1229_v12  ;;  %v610_v12 = vld [vmem:[#allocation7 + $0x298] sm:$0xff]  ;;  %v278_v13 = vld [vmem:[%s1798_s6 + $0x20] sm:$0xff]  ;;  %v1267_v15 = vpack.c.bf16 %v585_v7, %v582_v5  ;;  %v581_v16 = vld [vmem:[#allocation7 + $0x1b0] sm:$0xff]  ;;  %v1844_v20 = vpack.c.bf16 %v556_v10, %v553_v9 }
  0x8c   : > { %1296 = vmatprep.subr.bf16.mxu0 %v1809_v18  ;;  %1254 = vmatpush1.bf16.msra.mxu1 %v1253_v38  ;;  %v584_v17 = vld [vmem:[#allocation7 + $0x1c8] sm:$0xff]  ;;  %v591_v21 = vld [vmem:[#allocation7 + $0x200] sm:$0xff]  ;;  %v1847_v22 = vpack.c.bf16 %v610_v12, %v607_v11  ;;  %v613_v25 = vld [vmem:[#allocation7 + $0x2b0] sm:$0xff] }
  0x8d   : > { %1256 = vmatprep.subr.bf16.mxu1 %v1255_v39  ;;  %v588_v19 = vld [vmem:[#allocation7 + $0x1e8] sm:$0xff]  ;;  %v559_v23 = vld [vmem:[#allocation7 + $0x100] sm:$0xff]  ;;  %v1269_v28 = vpack.c.bf16 %v584_v17, %v581_v16  ;;  %v590_v33 = vld [vmem:[#allocation7 + $0x1f8] sm:$0xff] }
  0x8e   : > { %399 = vmatmul.mubr.f32.vlgmr.msra.gmra.mrb[0].mxu0 %v274_v24  ;;  %v562_v24 = vld [vmem:[#allocation7 + $0x118] sm:$0xff]  ;;  %v616_v26 = vld [vmem:[#allocation7 + $0x2c8] sm:$0xff]  ;;  %v1271_v29 = vpack.c.bf16 %v591_v21, %v588_v19  ;;  %v587_v31 = vld [vmem:[#allocation7 + $0x1e0] sm:$0xff] }
  0x8f   : > { %404 = vmatprep.mubr.f32.mxu0 %v1588_v0  ;;  %1298 = vmatpush3.bf16.msra.mxu0 %v1813_v30  ;;  %v279_v27 = vld [vmem:[%s1798_s6 + $0x28] sm:$0xff]  ;;  %v1852_v34 = vpack.c.bf16 %v562_v24, %v559_v23  ;;  %v594_v35 = vld [vmem:[#allocation7 + $0x218] sm:$0xff]  ;;  %v597_v36 = vld [vmem:[#allocation7 + $0x230] sm:$0xff]  ;;  %v1273_v39 = vpack.c.bf16 %v590_v33, %v587_v31  ;;  %v324_v33 = vlaneseq }
  0x90   : > { %1300 = vmatprep.subr.bf16.mxu0 %v1815_v32  ;;  %1258 = vmatpush1.bf16.msra.mxu1 %v1257_v51  ;;  %v280_v38 = vld [vmem:[%s1798_s6 + $0x30] sm:$0xff]  ;;  %v1275_v40 = vpack.c.bf16 %v597_v36, %v594_v35  ;;  %v596_v42 = vld [vmem:[#allocation7 + $0x228] sm:$0xff]  ;;  %v603_v46 = vld [vmem:[#allocation7 + $0x260] sm:$0xff] }
  0x91   : > { %1260 = vmatprep.subr.bf16.mxu1 %v1259_v52  ;;  %v593_v41 = vld [vmem:[#allocation7 + $0x210] sm:$0xff]  ;;  %v600_v44 = vld [vmem:[#allocation7 + $0x248] sm:$0xff]  ;;  %v281_v47 = vld [vmem:[%s1798_s6 + $0x38] sm:$0xff]  ;;  %v1889_v35 = vshrl.u32 %v324_v33, 7 }
  0x92   : > { %405 = vmatmul.mubr.f32.gmra.mrb[2].mxu0 %v275_v37  ;;  %v1855_v37 = vpack.c.bf16 %v616_v26, %v613_v25  ;;  %v1277_v48 = vpack.c.bf16 %v596_v42, %v593_v41  ;;  %v1279_v49 = vpack.c.bf16 %v603_v46, %v600_v44  ;;  %v602_v51 = vld [vmem:[#allocation7 + $0x258] sm:$0xff]  ;;  %v609_v53 = vld [vmem:[#allocation7 + $0x290] sm:$0xff]  ;;  %v282_v54 = vld [vmem:[%s1798_s6 + $0x40] sm:$0xff] }
  0x93   : > { %410 = vmatprep.mubr.f32.mxu0 %v1588_v0  ;;  %1302 = vmatpush3.bf16.msra.mxu0 %v1820_v43  ;;  %v606_v52 = vld [vmem:[#allocation7 + $0x278] sm:$0xff]  ;;  %v605_v59 = vld [vmem:[#allocation7 + $0x270] sm:$0xff]  ;;  %v608_v60 = vld [vmem:[#allocation7 + $0x288] sm:$0xff]  ;;  %v326_v36 = vsub.s32 0, %v1889_v35 }
  0x94   : > { %1304 = vmatprep.subr.bf16.mxu0 %v1823_v45  ;;  %1262 = vmatpush1.bf16.msra.mxu1 %v1261_v1  ;;  %v1283_v57 = vpack.c.bf16 %v609_v53, %v606_v52  ;;  %v612_v61 = vld [vmem:[#allocation7 + $0x2a8] sm:$0xff]  ;;  %v615_v62 = vld [vmem:[#allocation7 + $0x2c0] sm:$0xff]  ;;  %v1285_v1 = vpack.c.bf16 %v608_v60, %v605_v59  ;;  %v614_v4 = vld [vmem:[#allocation7 + $0x2b8] sm:$0xff] }
  0x95   : > { %1264 = vmatprep.subr.bf16.mxu1 %v1263_v2  ;;  %v1287_v2 = vpack.c.bf16 %v615_v62, %v612_v61  ;;  %v611_v3 = vld [vmem:[#allocation7 + $0x2a0] sm:$0xff]  ;;  %v284_v5 = vld [vmem:[%s1798_s6 + $0x50] sm:$0xff]  ;;  %v285_v9 = vld [vmem:[%s1798_s6 + $0x58] sm:$0xff] }
  0x96   : > { %411 = vmatmul.mubr.f32.gmra.mrb[4].mxu0 %v276_v50  ;;  %v599_v50 = vld [vmem:[#allocation7 + $0x240] sm:$0xff]  ;;  %v1289_v7 = vpack.c.bf16 %v614_v4, %v611_v3  ;;  %v287_v11 = vld [vmem:[%s1798_s6 + $0x68] sm:$0xff]  ;;  %v288_v12 = vld [vmem:[%s1798_s6 + $0x70] sm:$0xff] }
  0x97   : > { %416 = vmatprep.mubr.f32.mxu0 %v1588_v0  ;;  %1306 = vmatpush3.bf16.msra.mxu0 %v1828_v56  ;;  %v1281_v55 = vpack.c.bf16 %v602_v51, %v599_v50  ;;  %v286_v10 = vld [vmem:[%s1798_s6 + $0x60] sm:$0xff]  ;;  %v618_v17 = vld [vmem:[#allocation7 + $0x2d8] sm:$0xff]  ;;  %v621_v19 = vld [vmem:[#allocation7 + $0x2f0] sm:$0xff] }
  0x98   : > { %1308 = vmatprep.subr.bf16.mxu0 %v1831_v58  ;;  %1266 = vmatpush1.bf16.msra.mxu1 %v1265_v14  ;;  %v565_v14 = vld [vmem:[#allocation7 + $0x130] sm:$0xff]  ;;  %v619_v21 = vld [vmem:[#allocation7 + $0x2e0] sm:$0xff]  ;;  %v1291_v23 = vpack.c.bf16 %v621_v19, %v618_v17  ;;  %v620_v25 = vld [vmem:[#allocation7 + $0x2e8] sm:$0xff] }
  0x99   : > { %1268 = vmatprep.subr.bf16.mxu1 %v1267_v15  ;;  %v568_v15 = vld [vmem:[#allocation7 + $0x148] sm:$0xff]  ;;  %v617_v24 = vld [vmem:[#allocation7 + $0x2d0] sm:$0xff]  ;;  %v622_v26 = vld [vmem:[#allocation7 + $0x2f8] sm:$0xff] }
  0x9a   : > { %417 = vmatmul.mubr.f32.gmra.mrb[6].mxu0 %v277_v63  ;;  %v283_v63 = vld [vmem:[%s1798_s6 + $0x48] sm:$0xff]  ;;  %v1879_v16 = vpack.c.bf16 %v568_v15, %v565_v14 }
  0x9b   : > { %422 = vmatprep.mubr.f32.mxu0 %v1588_v0  ;;  %1310 = vmatpush3.bf16.msra.mxu0 %v1836_v6 }
  0x9c   : > { %1312 = vmatprep.subr.bf16.mxu0 %v1839_v8  ;;  %1270 = vmatpush1.bf16.msra.mxu1 %v1269_v28  ;;  %v1882_v28 = vpack.c.bf16 %v622_v26, %v619_v21 }
  0x9d   : > { %1272 = vmatprep.subr.bf16.mxu1 %v1271_v29  ;;  %v571_v29 = vld [vmem:[#allocation7 + $0x160] sm:$0xff] }
  0x9e   : > { %423 = vmatmul.mubr.f32.gmra.mrb[8].mxu0 %v278_v13  ;;  %v289_v13 = vld [vmem:[%s1798_s6 + $0x78] sm:$0xff]  ;;  %s1513_s6 = scalar_lea.vmem %s1512_s7, 12288 }
  0x9f   : > { %428 = vmatprep.mubr.f32.mxu0 %v1588_v0  ;;  %1314 = vmatpush3.bf16.msra.mxu0 %v1844_v20  ;;  %p1515_p9 = scmp.lt.s32.totalorder %s1513_s6, %s1507_s15 }
  0xa0   : > { %1316 = vmatprep.subr.bf16.mxu0 %v1847_v22  ;;  %1274 = vmatpush1.bf16.msra.mxu1 %v1273_v39  ;;  %v330_v39 = vsub.s32 1, %v1889_v35 }
  0xa1   : > { %1276 = vmatprep.subr.bf16.mxu1 %v1275_v40  ;;  %p1516_p12 = por %p1515_p9, %p1514_p5 }
  0xa2   : > { %429 = vmatmul.mubr.f32.gmra.mrb[10].mxu0 %v279_v27  ;;  %v1293_v27 = vpack.c.bf16 %v620_v25, %v617_v24 }
  0xa3   : > { %434 = vmatprep.mubr.f32.mxu0 %v1588_v0  ;;  %1318 = vmatpush3.bf16.msra.mxu0 %v1852_v34  ;;  %p1517_p2 = pnand %p1516_p12, %p1510_p3 }
  0xa4   : > { %1320 = vmatprep.subr.bf16.mxu0 %v1855_v37  ;;  %1278 = vmatpush1.bf16.msra.mxu1 %v1277_v48 }
  0xa5   : > { %1280 = vmatprep.subr.bf16.mxu1 %v1279_v49 }
  0xa6   : > { %435 = vmatmul.mubr.f32.gmra.mrb[12].mxu0 %v280_v38  ;;  %v322_v38 = vld [vmem:[%s2117_s2] sm:$0x3] }
  0xa7   : > { %440 = vmatprep.mubr.f32.mxu0 %v1588_v0  ;;  %1322 = vmatpush3.bf16.msra.mxu0 %v1879_v16  ;;  %v1898_v40 = vrot.slane %v322_v38, %v326_v36  ;;  %v1902_v41 = vrot.slane %v322_v38, %v330_v39 }
  0xa8   : > { %1282 = vmatpush1.bf16.msra.mxu1 %v1281_v55  ;;  %1324 = vmatprep.subr.bf16.mxu0 %v1882_v28 }
  0xa9   : > { %1284 = vmatprep.subr.bf16.mxu1 %v1283_v57 }
  0xaa   : > { %441 = vmatmul.mubr.f32.gmra.mrb[14].mxu0 %v281_v47 }
  0xab   : > { %446 = vmatprep.mubr.f32.mxu0 %v1588_v0 }
  0xac   : > { %1286 = vmatpush1.bf16.msra.mxu1 %v1285_v1 }
  0xad   : > { %1288 = vmatprep.subr.bf16.mxu1 %v1287_v2 }
  0xae   : > { %447 = vmatmul.mubr.f32.gmra.mrb[16].mxu0 %v282_v54 }
  0xaf   : > { %452 = vmatprep.mubr.f32.mxu0 %v1588_v0 }
  0xb0   : > { %1290 = vmatpush1.bf16.msra.mxu1 %v1289_v7 }
  0xb1   : > { %1292 = vmatprep.subr.bf16.mxu1 %v1291_v23 }
  0xb2   : > { %453 = vmatmul.mubr.f32.gmra.mrb[18].mxu0 %v283_v63 }
  0xb3   : > { %458 = vmatprep.mubr.f32.mxu0 %v1588_v0 }
  0xb4   : > { %1294 = vmatpush1.bf16.msra.mxu1 %v1293_v27 }
  0xb5   : > { %1327 = vmatprep.subr.bf16.mxu1 %v1809_v18 }
  0xb6   : > { %459 = vmatmul.mubr.f32.gmra.mrb[20].mxu0 %v284_v5 }
  0xb7   : > { %464 = vmatprep.mubr.f32.mxu0 %v1588_v0 }
  0xba   : > { %465 = vmatmul.mubr.f32.gmra.mrb[22].mxu0 %v285_v9 }
  0xbb   : > { %470 = vmatprep.mubr.f32.mxu0 %v1588_v0 }
  0xbe   : > { %471 = vmatmul.mubr.f32.gmra.mrb[24].mxu0 %v286_v10 }
  0xbf   : > { %476 = vmatprep.mubr.f32.mxu0 %v1588_v0 }
  0xc2   : > { %477 = vmatmul.mubr.f32.gmra.mrb[26].mxu0 %v287_v11 }
  0xc3   : > { %482 = vmatprep.mubr.f32.mxu0 %v1588_v0 }
  0xc6   : > { %483 = vmatmul.mubr.f32.gmra.mrb[28].mxu0 %v288_v12 }
  0xc7   : > { %488 = vmatprep.mubr.f32.mxu0 %v1588_v0  ;;  %v574_v0 = vld [vmem:[#allocation7 + $0x178] sm:$0xff] }
  0xc8   : > { %v1884_v31 = vpack.c.bf16 %v574_v0, %v571_v29 }
  0xca   : > { %489 = vmatmul.mubr.f32.gmra.mrb[30].mxu0 %v289_v13 }
  0xcb   : > { %1326 = vmatpush3.bf16.msra.mxu0 %v1884_v31 }
 0x161   : > { %v400_v18 = vpop.f32.mrb[0].mxu0 }
 0x162   : > { %v401_v42 = vadd.f32 %v400_v18, %v1898_v40  ;;  %v402_v44 = vpop.f32.mrb[1].mxu0 }
 0x163   : > { %v403_v46 = vadd.f32 %v402_v44, %v1902_v41 }
 0x164   : > { %v495_v49 = vmax.f32 %v401_v42, 0.0 }
 0x165   : > { %v496_v47 = vmax.f32 %v403_v46, 0.0  ;;  %v406_v48 = vpop.f32.mrb[2].mxu0 }
 0x166   : > { %v407_v50 = vadd.f32 %v406_v48, %v1898_v40  ;;  %v408_v51 = vpop.f32.mrb[3].mxu0 }
 0x167   : > { %v409_v52 = vadd.f32 %v408_v51, %v1902_v41  ;;  %704 = vmatprep.mubr.f32.mxu1 %v496_v47  ;;  %865 = vmatprep.mubr.f32.mxu0 %v496_v47 }
 0x168   : > { %705 = vmatmul.mubr.f32.vlgmr.msra.gmra.mrb[0].mxu1 %v495_v49  ;;  %866 = vmatmul.mubr.f32.vlgmr.msra.gmra.mrb[32].mxu0 %v495_v49  ;;  %v497_v55 = vmax.f32 %v407_v50, 0.0 }
 0x169   : > { %v498_v53 = vmax.f32 %v409_v52, 0.0  ;;  %1335 = vmatpush3.bf16.msra.mxu1 %v1813_v30  ;;  %v412_v54 = vpop.f32.mrb[4].mxu0 }
 0x16a   : > { %v413_v57 = vadd.f32 %v412_v54, %v1898_v40  ;;  %v414_v59 = vpop.f32.mrb[5].mxu0  ;;  %1328 = vmatprep.subr.bf16.mxu1 %v1815_v32 }
 0x16b   : > { %v415_v60 = vadd.f32 %v414_v59, %v1902_v41  ;;  %710 = vmatprep.mubr.f32.mxu1 %v498_v53  ;;  %870 = vmatprep.mubr.f32.mxu0 %v498_v53 }
 0x16c   : > { %711 = vmatmul.mubr.f32.gmra.mrb[2].mxu1 %v497_v55  ;;  %871 = vmatmul.mubr.f32.gmra.mrb[34].mxu0 %v497_v55  ;;  %v499_v63 = vmax.f32 %v413_v57, 0.0 }
 0x16d   : > { %v500_v61 = vmax.f32 %v415_v60, 0.0  ;;  %v418_v62 = vpop.f32.mrb[6].mxu0  ;;  %1336 = vmatpush3.bf16.msra.mxu1 %v1820_v43 }
 0x16e   : > { %v419_v30 = vadd.f32 %v418_v62, %v1898_v40  ;;  %v420_v1 = vpop.f32.mrb[7].mxu0  ;;  %1329 = vmatprep.subr.bf16.mxu1 %v1823_v45 }
 0x16f   : > { %v421_v2 = vadd.f32 %v420_v1, %v1902_v41  ;;  %716 = vmatprep.mubr.f32.mxu1 %v500_v61  ;;  %875 = vmatprep.mubr.f32.mxu0 %v500_v61 }
 0x170   : > { %717 = vmatmul.mubr.f32.gmra.mrb[4].mxu1 %v499_v63  ;;  %876 = vmatmul.mubr.f32.gmra.mrb[36].mxu0 %v499_v63  ;;  %v501_v4 = vmax.f32 %v419_v30, 0.0 }
 0x171   : > { %v502_v32 = vmax.f32 %v421_v2, 0.0  ;;  %v424_v3 = vpop.f32.mrb[8].mxu0  ;;  %1337 = vmatpush3.bf16.msra.mxu1 %v1828_v56 }
 0x172   : > { %v425_v5 = vadd.f32 %v424_v3, %v1898_v40  ;;  %v426_v43 = vpop.f32.mrb[9].mxu0  ;;  %1330 = vmatprep.subr.bf16.mxu1 %v1831_v58 }
 0x173   : > { %v427_v7 = vadd.f32 %v426_v43, %v1902_v41  ;;  %722 = vmatprep.mubr.f32.mxu1 %v502_v32  ;;  %880 = vmatprep.mubr.f32.mxu0 %v502_v32 }
 0x174   : > { %723 = vmatmul.mubr.f32.gmra.mrb[6].mxu1 %v501_v4  ;;  %881 = vmatmul.mubr.f32.gmra.mrb[38].mxu0 %v501_v4  ;;  %v503_v10 = vmax.f32 %v425_v5, 0.0 }
 0x175   : > { %v504_v45 = vmax.f32 %v427_v7, 0.0  ;;  %v430_v9 = vpop.f32.mrb[10].mxu0  ;;  %1338 = vmatpush3.bf16.msra.mxu1 %v1836_v6 }
 0x176   : > { %v431_v11 = vadd.f32 %v430_v9, %v1898_v40  ;;  %v432_v56 = vpop.f32.mrb[11].mxu0  ;;  %1331 = vmatprep.subr.bf16.mxu1 %v1839_v8 }
 0x177   : > { %v433_v12 = vadd.f32 %v432_v56, %v1902_v41  ;;  %728 = vmatprep.mubr.f32.mxu1 %v504_v45  ;;  %885 = vmatprep.mubr.f32.mxu0 %v504_v45 }
 0x178   : > { %729 = vmatmul.mubr.f32.gmra.mrb[8].mxu1 %v503_v10  ;;  %886 = vmatmul.mubr.f32.gmra.mrb[40].mxu0 %v503_v10  ;;  %v505_v14 = vmax.f32 %v431_v11, 0.0 }
 0x179   : > { %v506_v58 = vmax.f32 %v433_v12, 0.0  ;;  %v436_v13 = vpop.f32.mrb[12].mxu0  ;;  %1339 = vmatpush3.bf16.msra.mxu1 %v1844_v20 }
 0x17a   : > { %v437_v15 = vadd.f32 %v436_v13, %v1898_v40  ;;  %v438_v6 = vpop.f32.mrb[13].mxu0  ;;  %1332 = vmatprep.subr.bf16.mxu1 %v1847_v22 }
 0x17b   : > { %v439_v17 = vadd.f32 %v438_v6, %v1902_v41  ;;  %734 = vmatprep.mubr.f32.mxu1 %v506_v58  ;;  %890 = vmatprep.mubr.f32.mxu0 %v506_v58 }
 0x17c   : > { %735 = vmatmul.mubr.f32.gmra.mrb[10].mxu1 %v505_v14  ;;  %891 = vmatmul.mubr.f32.gmra.mrb[42].mxu0 %v505_v14  ;;  %v507_v21 = vmax.f32 %v437_v15, 0.0 }
 0x17d   : > { %v508_v8 = vmax.f32 %v439_v17, 0.0  ;;  %v442_v19 = vpop.f32.mrb[14].mxu0  ;;  %1340 = vmatpush3.bf16.msra.mxu1 %v1852_v34 }
 0x17e   : > { %v443_v23 = vadd.f32 %v442_v19, %v1898_v40  ;;  %v444_v20 = vpop.f32.mrb[15].mxu0  ;;  %1333 = vmatprep.subr.bf16.mxu1 %v1855_v37 }
 0x17f   : > { %v445_v24 = vadd.f32 %v444_v20, %v1902_v41  ;;  %740 = vmatprep.mubr.f32.mxu1 %v508_v8  ;;  %895 = vmatprep.mubr.f32.mxu0 %v508_v8 }
 0x180   : > { %741 = vmatmul.mubr.f32.gmra.mrb[12].mxu1 %v507_v21  ;;  %896 = vmatmul.mubr.f32.gmra.mrb[44].mxu0 %v507_v21  ;;  %v509_v26 = vmax.f32 %v443_v23, 0.0 }
 0x181   : > { %v510_v22 = vmax.f32 %v445_v24, 0.0  ;;  %v448_v25 = vpop.f32.mrb[16].mxu0  ;;  %1341 = vmatpush3.bf16.msra.mxu1 %v1879_v16 }
 0x182   : > { %v449_v27 = vadd.f32 %v448_v25, %v1898_v40  ;;  %v450_v34 = vpop.f32.mrb[17].mxu0  ;;  %1334 = vmatprep.subr.bf16.mxu1 %v1882_v28 }
 0x183   : > { %v451_v29 = vadd.f32 %v450_v34, %v1902_v41  ;;  %746 = vmatprep.mubr.f32.mxu1 %v510_v22  ;;  %900 = vmatprep.mubr.f32.mxu0 %v510_v22 }
 0x184   : > { %747 = vmatmul.mubr.f32.gmra.mrb[14].mxu1 %v509_v26  ;;  %901 = vmatmul.mubr.f32.gmra.mrb[46].mxu0 %v509_v26  ;;  %v511_v33 = vmax.f32 %v449_v27, 0.0 }
 0x185   : > { %v512_v37 = vmax.f32 %v451_v29, 0.0  ;;  %v454_v0 = vpop.f32.mrb[18].mxu0  ;;  %1342 = vmatpush3.bf16.msra.mxu1 %v1884_v31 }
 0x186   : > { %v455_v38 = vadd.f32 %v454_v0, %v1898_v40  ;;  %v456_v16 = vpop.f32.mrb[19].mxu0 }
 0x187   : > { %v457_v18 = vadd.f32 %v456_v16, %v1902_v41  ;;  %752 = vmatprep.mubr.f32.mxu1 %v512_v37  ;;  %905 = vmatprep.mubr.f32.mxu0 %v512_v37 }
 0x188   : > { %753 = vmatmul.mubr.f32.gmra.mrb[16].mxu1 %v511_v33  ;;  %906 = vmatmul.mubr.f32.gmra.mrb[48].mxu0 %v511_v33  ;;  %v513_v44 = vmax.f32 %v455_v38, 0.0 }
 0x189   : > { %v514_v28 = vmax.f32 %v457_v18, 0.0  ;;  %v460_v42 = vpop.f32.mrb[20].mxu0 }
 0x18a   : > { %v461_v46 = vadd.f32 %v460_v42, %v1898_v40  ;;  %v462_v47 = vpop.f32.mrb[21].mxu0 }
 0x18b   : > { %v463_v48 = vadd.f32 %v462_v47, %v1902_v41  ;;  %758 = vmatprep.mubr.f32.mxu1 %v514_v28  ;;  %910 = vmatprep.mubr.f32.mxu0 %v514_v28 }
 0x18c   : > { %759 = vmatmul.mubr.f32.gmra.mrb[18].mxu1 %v513_v44  ;;  %911 = vmatmul.mubr.f32.gmra.mrb[50].mxu0 %v513_v44  ;;  %v515_v50 = vmax.f32 %v461_v46, 0.0 }
 0x18d   : > { %v516_v31 = vmax.f32 %v463_v48, 0.0  ;;  %v466_v49 = vpop.f32.mrb[22].mxu0 }
 0x18e   : > { %v467_v51 = vadd.f32 %v466_v49, %v1898_v40  ;;  %v468_v52 = vpop.f32.mrb[23].mxu0 }
 0x18f   : > { %v469_v53 = vadd.f32 %v468_v52, %v1902_v41  ;;  %764 = vmatprep.mubr.f32.mxu1 %v516_v31  ;;  %915 = vmatprep.mubr.f32.mxu0 %v516_v31 }
 0x190   : > { %765 = vmatmul.mubr.f32.gmra.mrb[20].mxu1 %v515_v50  ;;  %916 = vmatmul.mubr.f32.gmra.mrb[52].mxu0 %v515_v50  ;;  %v517_v57 = vmax.f32 %v467_v51, 0.0 }
 0x191   : > { %v518_v54 = vmax.f32 %v469_v53, 0.0  ;;  %v472_v55 = vpop.f32.mrb[24].mxu0 }
 0x192   : > { %v473_v59 = vadd.f32 %v472_v55, %v1898_v40  ;;  %v474_v60 = vpop.f32.mrb[25].mxu0 }
 0x193   : > { %v475_v61 = vadd.f32 %v474_v60, %v1902_v41  ;;  %770 = vmatprep.mubr.f32.mxu1 %v518_v54  ;;  %920 = vmatprep.mubr.f32.mxu0 %v518_v54 }
 0x194   : > { %771 = vmatmul.mubr.f32.gmra.mrb[22].mxu1 %v517_v57  ;;  %921 = vmatmul.mubr.f32.gmra.mrb[54].mxu0 %v517_v57  ;;  %v519_v30 = vmax.f32 %v473_v59, 0.0 }
 0x195   : > { %v520_v62 = vmax.f32 %v475_v61, 0.0  ;;  %v478_v63 = vpop.f32.mrb[26].mxu0 }
 0x196   : > { %v479_v1 = vadd.f32 %v478_v63, %v1898_v40  ;;  %v480_v2 = vpop.f32.mrb[27].mxu0 }
 0x197   : > { %v481_v32 = vadd.f32 %v480_v2, %v1902_v41  ;;  %776 = vmatprep.mubr.f32.mxu1 %v520_v62 }
 0x198   : > { %777 = vmatmul.mubr.f32.gmra.mrb[24].mxu1 %v519_v30  ;;  %v521_v5 = vmax.f32 %v479_v1, 0.0 }
 0x199   : > { %v522_v3 = vmax.f32 %v481_v32, 0.0  ;;  %v484_v4 = vpop.f32.mrb[28].mxu0 }
 0x19a   : > { %v485_v43 = vadd.f32 %v484_v4, %v1898_v40  ;;  %v486_v7 = vpop.f32.mrb[29].mxu0 }
 0x19b   : > { %v487_v45 = vadd.f32 %v486_v7, %v1902_v41  ;;  %782 = vmatprep.mubr.f32.mxu1 %v522_v3 }
 0x19c   : > { %783 = vmatmul.mubr.f32.gmra.mrb[26].mxu1 %v521_v5  ;;  %v523_v11 = vmax.f32 %v485_v43, 0.0 }
 0x19d   : > { %v524_v9 = vmax.f32 %v487_v45, 0.0  ;;  %v490_v10 = vpop.f32.mrb[30].mxu0 }
 0x19e   : > { %v491_v56 = vadd.f32 %v490_v10, %v1898_v40  ;;  %v492_v12 = vpop.f32.mrb[31].mxu0  ;;  %v623_v40 = vld [vmem:[%s2119_s4] sm:$0x7] }
 0x19f   : > { %v493_v58 = vadd.f32 %v492_v12, %v1902_v41  ;;  %788 = vmatprep.mubr.f32.mxu1 %v524_v9  ;;  %v635_v41 = vsub.s32 2, %v1889_v35  ;;  %v1958_v15 = vrot.slane %v623_v40, %v326_v36  ;;  %v1962_v6 = vrot.slane %v623_v40, %v330_v39 }
 0x1a0   : > { %789 = vmatmul.mubr.f32.gmra.mrb[28].mxu1 %v523_v11  ;;  %v525_v14 = vmax.f32 %v491_v56, 0.0 }
 0x1a1   : > { %v526_v13 = vmax.f32 %v493_v58, 0.0  ;;  %v1964_v19 = vrot.slane %v623_v40, %v635_v41 }
 0x1a3   : > { %794 = vmatprep.mubr.f32.mxu1 %v526_v13 }
 0x1a4   : > { %795 = vmatmul.mubr.f32.gmra.mrb[30].mxu1 %v525_v14 }
 0x1a5   : > { %925 = vmatprep.mubr.f32.mxu1 %v520_v62 }
 0x1a8   : > { %926 = vmatmul.mubr.f32.vlgmr.msra.gmra.mrb[32].mxu1 %v519_v30 }
 0x1a9   : > { %930 = vmatprep.mubr.f32.mxu1 %v522_v3 }
 0x1ac   : > { %931 = vmatmul.mubr.f32.gmra.mrb[34].mxu1 %v521_v5 }
 0x1ad   : > { %935 = vmatprep.mubr.f32.mxu1 %v524_v9 }
 0x1b0   : > { %936 = vmatmul.mubr.f32.gmra.mrb[36].mxu1 %v523_v11 }
 0x1b1   : > { %940 = vmatprep.mubr.f32.mxu1 %v526_v13 }
 0x1b4   : > { %941 = vmatmul.mubr.f32.gmra.mrb[38].mxu1 %v525_v14 }
 0x23b   : > { %v706_v17 = vpop.f32.mrb[0].mxu1  ;;  %v1151_v8 = vpop.f32.mrb[32].mxu0 }
 0x23c   : > { %v707_v21 = vadd.f32 %v706_v17, %v1958_v15  ;;  %v708_v23 = vpop.f32.mrb[1].mxu1  ;;  %v1152_v20 = vpop.f32.mrb[33].mxu0 }
 0x23d   : > { %v709_v24 = vadd.f32 %v708_v23, %v1962_v6  ;;  %v1153_v22 = vadd.f32 %v1152_v20, %v1151_v8 }
 0x23e   : > { %946 = vst [vmem:[%s1968_s13] sm:$0xff] %v707_v21 }
 0x23f   : > { %947 = vst [vmem:[%s1968_s13 + $0x8] sm:$0xff] %v709_v24  ;;  %v868_v35 = vadd.f32 %v1153_v22, %v1964_v19  ;;  %v712_v36 = vpop.f32.mrb[2].mxu1  ;;  %v1154_v39 = vpop.f32.mrb[34].mxu0 }
 0x240   : > { %v713_v25 = vadd.f32 %v712_v36, %v1958_v15  ;;  %v714_v26 = vpop.f32.mrb[3].mxu1  ;;  %v1155_v27 = vpop.f32.mrb[35].mxu0 }
 0x241   : > { %948 = vst [vmem:[%s1968_s13 + $0x10] sm:$0xff] %v868_v35  ;;  %v715_v34 = vadd.f32 %v714_v26, %v1962_v6  ;;  %v1156_v29 = vadd.f32 %v1155_v27, %v1154_v39 }
 0x242   : > { %949 = vst [vmem:[%s1968_s13 + $0x18] sm:$0xff] %v713_v25 }
 0x243   : > { %950 = vst [vmem:[%s1968_s13 + $0x20] sm:$0xff] %v715_v34  ;;  %v873_v37 = vadd.f32 %v1156_v29, %v1964_v19  ;;  %v718_v0 = vpop.f32.mrb[4].mxu1  ;;  %v1157_v33 = vpop.f32.mrb[36].mxu0 }
 0x244   : > { %v719_v38 = vadd.f32 %v718_v0, %v1958_v15  ;;  %v720_v16 = vpop.f32.mrb[5].mxu1  ;;  %v1158_v18 = vpop.f32.mrb[37].mxu0 }
 0x245   : > { %951 = vst [vmem:[%s1968_s13 + $0x28] sm:$0xff] %v873_v37  ;;  %v721_v28 = vadd.f32 %v720_v16, %v1962_v6  ;;  %v1159_v42 = vadd.f32 %v1158_v18, %v1157_v33 }
 0x246   : > { %952 = vst [vmem:[%s1968_s13 + $0x30] sm:$0xff] %v719_v38 }
 0x247   : > { %953 = vst [vmem:[%s1968_s13 + $0x38] sm:$0xff] %v721_v28  ;;  %v878_v44 = vadd.f32 %v1159_v42, %v1964_v19  ;;  %v724_v46 = vpop.f32.mrb[6].mxu1  ;;  %v1160_v47 = vpop.f32.mrb[38].mxu0 }
 0x248   : > { %v725_v48 = vadd.f32 %v724_v46, %v1958_v15  ;;  %v726_v31 = vpop.f32.mrb[7].mxu1  ;;  %v1161_v49 = vpop.f32.mrb[39].mxu0 }
 0x249   : > { %954 = vst [vmem:[%s1968_s13 + $0x40] sm:$0xff] %v878_v44  ;;  %v727_v50 = vadd.f32 %v726_v31, %v1962_v6  ;;  %v1162_v51 = vadd.f32 %v1161_v49, %v1160_v47 }
 0x24a   : > { %955 = vst [vmem:[%s1968_s13 + $0x48] sm:$0xff] %v725_v48 }
 0x24b   : > { %956 = vst [vmem:[%s1968_s13 + $0x50] sm:$0xff] %v727_v50  ;;  %v883_v52 = vadd.f32 %v1162_v51, %v1964_v19  ;;  %v730_v53 = vpop.f32.mrb[8].mxu1  ;;  %v1163_v54 = vpop.f32.mrb[40].mxu0 }
 0x24c   : > { %v731_v55 = vadd.f32 %v730_v53, %v1958_v15  ;;  %v732_v57 = vpop.f32.mrb[9].mxu1  ;;  %v1164_v59 = vpop.f32.mrb[41].mxu0 }
 0x24d   : > { %957 = vst [vmem:[%s1968_s13 + $0x58] sm:$0xff] %v883_v52  ;;  %v733_v60 = vadd.f32 %v732_v57, %v1962_v6  ;;  %v1165_v61 = vadd.f32 %v1164_v59, %v1163_v54 }
 0x24e   : > { %958 = vst [vmem:[%s1968_s13 + $0x60] sm:$0xff] %v731_v55 }
 0x24f   : > { %959 = vst [vmem:[%s1968_s13 + $0x68] sm:$0xff] %v733_v60  ;;  %v888_v62 = vadd.f32 %v1165_v61, %v1964_v19  ;;  %v736_v63 = vpop.f32.mrb[10].mxu1  ;;  %v1166_v30 = vpop.f32.mrb[42].mxu0 }
 0x250   : > { %v737_v1 = vadd.f32 %v736_v63, %v1958_v15  ;;  %v738_v2 = vpop.f32.mrb[11].mxu1  ;;  %v1167_v32 = vpop.f32.mrb[43].mxu0 }
 0x251   : > { %960 = vst [vmem:[%s1968_s13 + $0x70] sm:$0xff] %v888_v62  ;;  %v739_v3 = vadd.f32 %v738_v2, %v1962_v6  ;;  %v1168_v4 = vadd.f32 %v1167_v32, %v1166_v30 }
 0x252   : > { %961 = vst [vmem:[%s1968_s13 + $0x78] sm:$0xff] %v737_v1 }
 0x253   : > { %962 = vst [vmem:[%s1968_s13 + $0x80] sm:$0xff] %v739_v3  ;;  %v893_v5 = vadd.f32 %v1168_v4, %v1964_v19  ;;  %v742_v43 = vpop.f32.mrb[12].mxu1  ;;  %v1169_v7 = vpop.f32.mrb[44].mxu0 }
 0x254   : > { %v743_v45 = vadd.f32 %v742_v43, %v1958_v15  ;;  %v744_v9 = vpop.f32.mrb[13].mxu1  ;;  %v1170_v10 = vpop.f32.mrb[45].mxu0 }
 0x255   : > { %963 = vst [vmem:[%s1968_s13 + $0x88] sm:$0xff] %v893_v5  ;;  %v745_v11 = vadd.f32 %v744_v9, %v1962_v6  ;;  %v1171_v56 = vadd.f32 %v1170_v10, %v1169_v7 }
 0x256   : > { %964 = vst [vmem:[%s1968_s13 + $0x90] sm:$0xff] %v743_v45 }
 0x257   : > { %965 = vst [vmem:[%s1968_s13 + $0x98] sm:$0xff] %v745_v11  ;;  %v898_v12 = vadd.f32 %v1171_v56, %v1964_v19  ;;  %v748_v58 = vpop.f32.mrb[14].mxu1  ;;  %v1172_v13 = vpop.f32.mrb[46].mxu0 }
 0x258   : > { %v749_v14 = vadd.f32 %v748_v58, %v1958_v15  ;;  %v750_v40 = vpop.f32.mrb[15].mxu1  ;;  %v1173_v41 = vpop.f32.mrb[47].mxu0 }
 0x259   : > { %966 = vst [vmem:[%s1968_s13 + $0xa0] sm:$0xff] %v898_v12  ;;  %v751_v17 = vadd.f32 %v750_v40, %v1962_v6  ;;  %v1174_v8 = vadd.f32 %v1173_v41, %v1172_v13 }
 0x25a   : > { %967 = vst [vmem:[%s1968_s13 + $0xa8] sm:$0xff] %v749_v14 }
 0x25b   : > { %968 = vst [vmem:[%s1968_s13 + $0xb0] sm:$0xff] %v751_v17  ;;  %v903_v21 = vadd.f32 %v1174_v8, %v1964_v19  ;;  %v754_v23 = vpop.f32.mrb[16].mxu1  ;;  %v1175_v20 = vpop.f32.mrb[48].mxu0 }
 0x25c   : > { %v755_v24 = vadd.f32 %v754_v23, %v1958_v15  ;;  %v756_v22 = vpop.f32.mrb[17].mxu1  ;;  %v1176_v35 = vpop.f32.mrb[49].mxu0 }
 0x25d   : > { %969 = vst [vmem:[%s1968_s13 + $0xb8] sm:$0xff] %v903_v21  ;;  %v757_v36 = vadd.f32 %v756_v22, %v1962_v6  ;;  %v1177_v39 = vadd.f32 %v1176_v35, %v1175_v20 }
 0x25e   : > { %970 = vst [vmem:[%s1968_s13 + $0xc0] sm:$0xff] %v755_v24 }
 0x25f   : > { %971 = vst [vmem:[%s1968_s13 + $0xc8] sm:$0xff] %v757_v36  ;;  %v908_v25 = vadd.f32 %v1177_v39, %v1964_v19  ;;  %v760_v26 = vpop.f32.mrb[18].mxu1  ;;  %v1178_v27 = vpop.f32.mrb[50].mxu0 }
 0x260   : > { %v761_v34 = vadd.f32 %v760_v26, %v1958_v15  ;;  %v762_v29 = vpop.f32.mrb[19].mxu1  ;;  %v1179_v37 = vpop.f32.mrb[51].mxu0 }
 0x261   : > { %972 = vst [vmem:[%s1968_s13 + $0xd0] sm:$0xff] %v908_v25  ;;  %v763_v0 = vadd.f32 %v762_v29, %v1962_v6  ;;  %v1180_v33 = vadd.f32 %v1179_v37, %v1178_v27 }
 0x262   : > { %973 = vst [vmem:[%s1968_s13 + $0xd8] sm:$0xff] %v761_v34 }
 0x263   : > { %974 = vst [vmem:[%s1968_s13 + $0xe0] sm:$0xff] %v763_v0  ;;  %v913_v38 = vadd.f32 %v1180_v33, %v1964_v19  ;;  %v766_v16 = vpop.f32.mrb[20].mxu1  ;;  %v1181_v18 = vpop.f32.mrb[52].mxu0 }
 0x264   : > { %v767_v28 = vadd.f32 %v766_v16, %v1958_v15  ;;  %v768_v42 = vpop.f32.mrb[21].mxu1  ;;  %v1182_v44 = vpop.f32.mrb[53].mxu0 }
 0x265   : > { %975 = vst [vmem:[%s1968_s13 + $0xe8] sm:$0xff] %v913_v38  ;;  %v769_v46 = vadd.f32 %v768_v42, %v1962_v6  ;;  %v1183_v47 = vadd.f32 %v1182_v44, %v1181_v18 }
 0x266   : > { %976 = vst [vmem:[%s1968_s13 + $0xf0] sm:$0xff] %v767_v28 }
 0x267   : > { %977 = vst [vmem:[%s1968_s13 + $0xf8] sm:$0xff] %v769_v46  ;;  %v918_v48 = vadd.f32 %v1183_v47, %v1964_v19  ;;  %v772_v31 = vpop.f32.mrb[22].mxu1  ;;  %v1184_v49 = vpop.f32.mrb[54].mxu0 }
 0x268   : > { %v773_v50 = vadd.f32 %v772_v31, %v1958_v15  ;;  %v774_v51 = vpop.f32.mrb[23].mxu1  ;;  %v1185_v52 = vpop.f32.mrb[55].mxu0 }
 0x269   : > { %978 = vst [vmem:[%s1968_s13 + $0x100] sm:$0xff] %v918_v48  ;;  %v775_v53 = vadd.f32 %v774_v51, %v1962_v6  ;;  %v1186_v54 = vadd.f32 %v1185_v52, %v1184_v49 }
 0x26a   : > { %979 = vst [vmem:[%s1968_s13 + $0x108] sm:$0xff] %v773_v50 }
 0x26b   : > { %980 = vst [vmem:[%s1968_s13 + $0x110] sm:$0xff] %v775_v53  ;;  %v923_v55 = vadd.f32 %v1186_v54, %v1964_v19  ;;  %v778_v57 = vpop.f32.mrb[24].mxu1 }
 0x26c   : > { %v779_v59 = vadd.f32 %v778_v57, %v1958_v15  ;;  %v780_v60 = vpop.f32.mrb[25].mxu1 }
 0x26d   : > { %981 = vst [vmem:[%s1968_s13 + $0x118] sm:$0xff] %v923_v55  ;;  %v781_v61 = vadd.f32 %v780_v60, %v1962_v6 }
 0x26e   : > { %982 = vst [vmem:[%s1968_s13 + $0x120] sm:$0xff] %v779_v59 }
 0x26f   : > { %983 = vst [vmem:[%s1968_s13 + $0x128] sm:$0xff] %v781_v61  ;;  %v784_v62 = vpop.f32.mrb[26].mxu1 }
 0x270   : > { %v785_v63 = vadd.f32 %v784_v62, %v1958_v15  ;;  %v786_v30 = vpop.f32.mrb[27].mxu1 }
 0x271   : > { %v787_v1 = vadd.f32 %v786_v30, %v1962_v6 }
 0x272   : > { %985 = vst [vmem:[%s1968_s13 + $0x138] sm:$0xff] %v785_v63 }
 0x273   : > { %986 = vst [vmem:[%s1968_s13 + $0x140] sm:$0xff] %v787_v1  ;;  %v790_v2 = vpop.f32.mrb[28].mxu1 }
 0x274   : > { %v791_v32 = vadd.f32 %v790_v2, %v1958_v15  ;;  %v792_v3 = vpop.f32.mrb[29].mxu1 }
 0x275   : > { %v793_v4 = vadd.f32 %v792_v3, %v1962_v6 }
 0x276   : > { %988 = vst [vmem:[%s1968_s13 + $0x150] sm:$0xff] %v791_v32 }
 0x277   : > { %989 = vst [vmem:[%s1968_s13 + $0x158] sm:$0xff] %v793_v4  ;;  %v796_v5 = vpop.f32.mrb[30].mxu1 }
 0x278   : > { %v797_v43 = vadd.f32 %v796_v5, %v1958_v15  ;;  %v798_v7 = vpop.f32.mrb[31].mxu1 }
 0x279   : > { %v799_v45 = vadd.f32 %v798_v7, %v1962_v6 }
 0x27a   : > { %991 = vst [vmem:[%s1968_s13 + $0x168] sm:$0xff] %v797_v43 }
 0x27b   : > { %992 = vst [vmem:[%s1968_s13 + $0x170] sm:$0xff] %v799_v45  ;;  %v1187_v9 = vpop.f32.mrb[32].mxu1 }
 0x27c   : > { %v1188_v10 = vpop.f32.mrb[33].mxu1 }
 0x27d   : > { %v1189_v11 = vadd.f32 %v1188_v10, %v1187_v9 }
 0x27f   : > { %v928_v56 = vadd.f32 %v1189_v11, %v1964_v19  ;;  %v1190_v12 = vpop.f32.mrb[34].mxu1 }
 0x280   : > { %v1191_v58 = vpop.f32.mrb[35].mxu1 }
 0x281   : > { %984 = vst [vmem:[%s1968_s13 + $0x130] sm:$0xff] %v928_v56  ;;  %v1192_v13 = vadd.f32 %v1191_v58, %v1190_v12 }
 0x283   : > { %v933_v15 = vadd.f32 %v1192_v13, %v1964_v19  ;;  %v1193_v14 = vpop.f32.mrb[36].mxu1 }
 0x284   : > { %v1194_v6 = vpop.f32.mrb[37].mxu1 }
 0x285   : > { %987 = vst [vmem:[%s1968_s13 + $0x148] sm:$0xff] %v933_v15  ;;  %v1195_v40 = vadd.f32 %v1194_v6, %v1193_v14 }
 0x287   : > { %v938_v41 = vadd.f32 %v1195_v40, %v1964_v19  ;;  %v1196_v17 = vpop.f32.mrb[38].mxu1 }
 0x288   : > { %v1197_v8 = vpop.f32.mrb[39].mxu1 }
 0x289   : > { %990 = vst [vmem:[%s1968_s13 + $0x160] sm:$0xff] %v938_v41  ;;  %v1198_v21 = vadd.f32 %v1197_v8, %v1196_v17 }
 0x28b   : > { %v943_v23 = vadd.f32 %v1198_v21, %v1964_v19 }
 0x28d   : > { %993 = vst [vmem:[%s1968_s13 + $0x178] sm:$0xff] %v943_v23 }
 0x28e   : > { %1520 = shalt.err (!%p1517_p2)
}
 0x28f   : > { %s1521_s24 = scalar_lea.hbm %s2067_s14, 6144  ;;  %s1525_s28 = scalar_lea.hbm %s2120_s5, 12288 }
 0x290   : > { %p1522_p13 = scmp.ne.s32.totalorder %s2067_s14, %s1521_s24  ;;  %p1526_p4 = scmp.lt.u32.totalorder %s2067_s14, %s2120_s5 }
 0x291   : > { %p1527_p7 = scmp.lt.u32.totalorder %s1525_s28, %s1521_s24  ;;  %p1529_p11 = scmp.lt.u32.totalorder %s1521_s24, %s2067_s14 }
 0x292   : > { %p1523_p6 = pnand %p1522_p13, %p2134_p0 }
 0x293   : > { %p1528_p8 = por %p1527_p7, %p1526_p4 }
 0x294   : > { %p1524_p10 = pneg %p1523_p6 }
 0x295   : > { %p1530_p1 = por %p1529_p11, %p1528_p8 }
 0x297   : > { %p1531_p3 = pnand %p1530_p1, %p1524_p10 }
 0x299   : > { %1534 = shalt.err (!%p1531_p3)
}
 0x29a   : > { %s1590_s29 = smov 384   ;;  %s1591_s9 = smov 24  }
 0x29b   : > { %1355 = dma.vmem_to_hbm [thread:$0]  (%p2134_p0), %s2069_s8, 6144, %s2067_s14, %s995_s22, %s1590_s29, %s1590_s29, %s1591_s9  }
 0x29c PF: > { %s1024_s11 = sand.u32 1, %s1565_s18   ;;  %p2135_p5 = scmp.ne.s32.totalorder %s2125_s25, 0 }
 0x29d   : > { %p2136_p9 = scmp.ge.s32.totalorder %s1577_s21, 2  ;;  %s1025_s15 = scalar_lea.sflag [#allocation4], %s1024_s11 }
 0x29f   : > { %p1369_p12 = pnand %p2136_p9, %p2135_p5 }
 0x2a1   : > { %1560 = dma.done.wait (!%p1369_p12), %s1025_s15, 6144  }
 0x2a2   : > { %1562 = vsyncadd (!%p1369_p12), %s1025_s15, 4294961152  ;;  %p19_p2 = scmp.ge.s32.totalorder %s1732_s16, 4   ;;  %s2137_s18 = smov %s1569_s19 }
 0x2a3   : > { %s2138_s19 = smov %s1573_s20  ;;  %s2139_s20 = smov %s1741_s27 }
 0x2a4   : > { %s2140_s21 = smov %s1732_s16  ;;  %21 = sbr.rel (!%p19_p2) target bundleno = 6 (0x6), region = 93 }
 0x2ab   :  { %1030 = vsyncpa [#allocation3], 1 }
 0x2ac   :  { %1032 = vsyncpa [#allocation3 + $0x1], 1 }
 0x2ad   :  { %1033 = vsyncpa [#allocation6], 1 }
 0x2ae   :  { %1034 = vsyncpa [#allocation4], 1 }
 0x2af   :  { %1036 = vsyncpa [#allocation4 + $0x1], 1 }

</bundles_post_ra>
